<compile_context>
chip_gen: v6e
topology: v6e:2x2x1
jax: 0.10.0
libtpu: 0.0.40
codegen_flags: <defaults>
</compile_context>

<pallas_src>
import functools

import jax
import jax.numpy as jnp
from jax import lax
from jax.experimental import pallas as pl
from jax.experimental.pallas import tpu as pltpu


# --------------------------------------------------------------------------- #
# Hardware-aware knobs
# --------------------------------------------------------------------------- #

def _vmem_limit_bytes():
    """Scoped-VMEM budget derived from physical VMEM (v7x: 64 MiB per core)."""
    cap = 64 * 1024 * 1024
    try:
        hw = int(pltpu.get_tpu_info().vmem_capacity_bytes)
        if hw >= 32 * 1024 * 1024:
            cap = hw
    except Exception:
        pass
    return int(min(cap - 8 * 1024 * 1024, 100 * 1024 * 1024))


@functools.lru_cache(maxsize=None)
def _mxu_is_256():
    """True on chips with a 256-wide MXU N dimension (v6e / v7x)."""
    try:
        kind = jax.devices()[0].device_kind.lower()
    except Exception:
        return True
    return not any(tag in kind for tag in ("v2", "v3", "v4", "v5"))


@functools.lru_cache(maxsize=None)
def _roll_sign():
    """Direction probe for pltpu.roll: +1 if it matches jnp.roll, else -1.

    The probe runs the exact same backend / lowering path as the real kernels
    in this script (no interpret mode), so it cannot disagree with them.
    """
    def probe(x_ref, o_ref):
        o_ref[...] = pltpu.roll(x_ref[...], shift=1, axis=0)

    x = lax.broadcasted_iota(jnp.float32, (8, 128), 0)
    y = pl.pallas_call(probe, out_shape=jax.ShapeDtypeStruct((8, 128), jnp.float32))(x)
    return 1 if float(y[1, 0]) == 0.0 else -1


def _pick_band(cap_rows, limit_rows):
    band = min(64, max(1, cap_rows))
    if band >= 8:
        band -= band % 8
    return max(1, min(band, limit_rows))


# --------------------------------------------------------------------------- #
# Kernel 1: dense conv for tiny cin (conv1_1) -- single K = 9*cin matmul
# --------------------------------------------------------------------------- #

def _dense_conv_kernel(x_ref, w_ref, b_ref, o_ref, *, Hb, W, K, cout, band):
    """x_ref: (1, Hb, W, K) bf16 im2col patches; w_ref: (K, cout) bf16;
    b_ref: (1, cout) f32; o_ref: (1, Hb, W, cout) bf16 (pre-ReLU)."""
    w = w_ref[...]
    bias = b_ref[...]
    for r0 in range(0, Hb, band):
        tb = min(band, Hb - r0)
        src = x_ref[0, r0:r0 + tb].reshape(tb * W, K)
        out = jnp.dot(src, w, preferred_element_type=jnp.float32) + bias
        o_ref[0, r0:r0 + tb] = out.reshape(tb, W, cout).astype(o_ref.dtype)


def conv3x3_cin3(x, w, b):
    """Conv2d(3x3, stride 1, pad 1) for tiny cin via one K=9*cin matmul.

    x: (N, H, W, cin) bf16 NHWC;  w: (3, 3, cin, cout) f32;  b: (cout,) f32.
    """
    N, H, W, cin = x.shape
    cout = w.shape[-1]
    K = 9 * cin

    # im2col in XLA (the 3-channel input is tiny; this is the only wrapper pad)
    xp = jnp.pad(x, ((0, 0), (1, 1), (1, 1), (0, 0)))
    patches = jnp.concatenate(
        [xp[:, dy:dy + H, dx:dx + W, :] for dy in range(3) for dx in range(3)],
        axis=-1).astype(jnp.bfloat16)                       # (N, H, W, 9*cin)

    wk = w.astype(jnp.bfloat16).reshape(K, cout)            # (dy, dx, cin) major->minor
    b2 = b.astype(jnp.float32).reshape(1, cout)

    rb = H
    for cand in (56, 64, 32, 28, 16, 8):
        if H % cand == 0:
            rb = cand
            break

    per_row = W * (2 * K + 8 * cout)
    band = _pick_band((4 * 1024 * 1024) // max(per_row, 1), rb)

    kernel = functools.partial(_dense_conv_kernel, Hb=rb, W=W, K=K,
                               cout=cout, band=band)

    return pl.pallas_call(
        kernel,
        out_shape=jax.ShapeDtypeStruct((N, H, W, cout), jnp.bfloat16),
        grid_spec=pltpu.PrefetchScalarGridSpec(
            num_scalar_prefetch=0,
            grid=(N, H // rb),
            in_specs=[
                pl.BlockSpec((1, rb, W, K), lambda n, r: (n, r, 0, 0)),
                pl.BlockSpec((K, cout), lambda n, r: (0, 0)),
                pl.BlockSpec((1, cout), lambda n, r: (0, 0)),
            ],
            out_specs=pl.BlockSpec((1, rb, W, cout), lambda n, r: (n, r, 0, 0)),
        ),
        compiler_params=pltpu.CompilerParams(
            dimension_semantics=("parallel", "parallel"),
            vmem_limit_bytes=_vmem_limit_bytes()),
    )(patches, wk, b2)


# --------------------------------------------------------------------------- #
# Kernel 2: fused [ReLU] -> [MaxPool 2x2/2] -> Conv2d(3x3, pad=1), dy folded
# into K (3 matmuls per row band, one per dx, each with K = 3*cin)
# --------------------------------------------------------------------------- #

def _conv3x3_kernel(x_ref, w_ref, b_ref, o_ref, *scratch, H, W, cin, ct, band,
                    relu_input, pool_input, roll_sign):
    """One (batch element, cout tile) of the fused block.

    x_ref:  (1, Hin, Win, cin) bf16   (Hin, Win) = (2H, 2W) if pool_input
    w_ref:  (3, 3*cin, ct)     bf16   dim0 = dx, K ordered [dy major, cin minor]
    b_ref:  (1, ct)            f32
    o_ref:  (1, H, W, ct)      bf16   pre-ReLU conv output
    scratch[0] (pool only): (H+2, W, cin) bf16 persistent pooled+ReLU'd image
                            with zero padding rows at 0 and H+1.
    """
    pool_ref = scratch[0] if pool_input else None
    n_full = band * W

    # padding-column masks, built once per kernel invocation (hoisted)
    colf = lax.broadcasted_iota(jnp.int32, (band, W, 1), 1).reshape(n_full, 1)
    m_first = colf == 0
    m_last = colf == (W - 1)
    bias = b_ref[...]                                         # (1, ct) f32

    if pool_input:
        # Pooled + ReLU'd input computed once per batch element (ct tile 0 only;
        # the cout-tile grid axis is the innermost, "arbitrary" axis).
        @pl.when(pl.program_id(1) == 0)
        def _():
            xin = x_ref[0]                                    # (2H, 2W, cin)
            xin = jnp.max(xin.reshape(H, 2, 2 * W, cin), axis=1)   # row pairs
            xin = jnp.max(xin.reshape(H, W, 2, cin), axis=2)       # column pairs
            if relu_input:
                xin = jnp.maximum(xin, 0)
            pool_ref[0:1] = jnp.zeros((1, W, cin), pool_ref.dtype)
            pool_ref[1:H + 1] = xin
            pool_ref[H + 1:H + 2] = jnp.zeros((1, W, cin), pool_ref.dtype)

    # statically unrolled row bands keep the live f32/bf16 transients small
    for r0 in range(0, H, band):
        tb = min(band, H - r0)
        n = tb * W

        if pool_input:
            xb = pool_ref[r0:r0 + tb + 2]                     # (tb+2, W, cin)
        else:
            lo, hi = r0 - 1, r0 + tb + 1
            core = x_ref[0, max(lo, 0):min(hi, H)]            # windowed row load
            if relu_input:
                core = jnp.maximum(core, 0)                   # ReLU once per band
            pieces = []
            if lo < 0:
                pieces.append(jnp.zeros((1, W, cin), core.dtype))
            pieces.append(core)
            if hi > H:
                pieces.append(jnp.zeros((hi - H, W, cin), core.dtype))
            xb = jnp.concatenate(pieces, axis=0) if len(pieces) > 1 else core

        # dy folded into K: LHS row i = [x[r-1], x[r], x[r+1]] for output row r
        lhs = jnp.concatenate(
            [xb[d:d + tb].reshape(n, cin) for d in range(3)], axis=-1)  # (n, 3cin)

        # dx = 1 (center column tap): no shift
        acc = jnp.dot(lhs, w_ref[1], preferred_element_type=jnp.float32)

        # dx = 0 (left column tap): shift result by +1 along the flattened row
        # axis (XLU roll) and zero the wrapped padding column (col 0)
        p = jnp.dot(lhs, w_ref[0], preferred_element_type=jnp.float32)
        p = pltpu.roll(p, shift=roll_sign % n, axis=0)
        acc = acc + jnp.where(m_first[:n], 0.0, p)

        # dx = 2 (right column tap): shift by -1, zero col W-1
        p = jnp.dot(lhs, w_ref[2], preferred_element_type=jnp.float32)
        p = pltpu.roll(p, shift=(-roll_sign) % n, axis=0)
        acc = acc + jnp.where(m_last[:n], 0.0, p)

        out = acc + bias
        o_ref[0, r0:r0 + tb] = out.reshape(tb, W, ct).astype(o_ref.dtype)


def conv3x3_block(x, w, b, *, relu_input, pool_input):
    """[ReLU] -> [MaxPool 2x2/2] -> Conv2d(3x3, stride 1, pad 1); pre-ReLU output.

    x: (N, Hin, Win, cin) bf16 NHWC;  w: (3, 3, cin, cout) f32;  b: (cout,) f32.
    Returns (N, Hout, Wout, cout) bf16, Hout = Hin//2 if pool_input else Hin.
    """
    N, Hin, Win, cin = x.shape
    cout = w.shape[-1]
    H, W = (Hin // 2, Win // 2) if pool_input else (Hin, Win)

    # cout tile: use the full 256-wide MXU N dimension on v6e/v7x
    if cout <= 128:
        ct = cout
    elif _mxu_is_256() and cout % 256 == 0:
        ct = 256
    else:
        ct = 128
    n_ct = cout // ct

    # row-band size bounding the in-kernel transients (LHS bf16 + f32 results)
    per_row = W * (6 * cin + 8 * ct)
    band = _pick_band((6 * 1024 * 1024) // max(per_row, 1), H)

    # weights: (dy, dx, cin, cout) -> (dx, [dy, cin], cout) to match the LHS fold
    wt = jnp.transpose(w, (1, 0, 2, 3)).reshape(3, 3 * cin, cout).astype(jnp.bfloat16)
    b2 = b.astype(jnp.float32).reshape(1, cout)

    # Grid order: keep the larger re-used operand resident in VMEM.  Pool layers
    # are forced batch-major so the pooled prologue is computed once per image.
    x_bytes = Hin * Win * cin * 2
    w_bytes = 9 * cin * cout * 2
    batch_major = pool_input or not (N * x_bytes * (n_ct - 1) < w_bytes * (N - 1))

    if batch_major:
        grid = (N, n_ct)

        def b_of(g0, g1):
            return g0

        def j_of(g0, g1):
            return g1

        sem = ("parallel", "arbitrary" if pool_input else "parallel")
    else:
        grid = (n_ct, N)

        def b_of(g0, g1):
            return g1

        def j_of(g0, g1):
            return g0

        sem = ("parallel", "parallel")

    kernel = functools.partial(
        _conv3x3_kernel, H=H, W=W, cin=cin, ct=ct, band=band,
        relu_input=relu_input, pool_input=pool_input, roll_sign=_roll_sign())

    scratch = [pltpu.VMEM((H + 2, W, cin), jnp.bfloat16)] if pool_input else []

    return pl.pallas_call(
        kernel,
        out_shape=jax.ShapeDtypeStruct((N, H, W, cout), jnp.bfloat16),
        grid_spec=pltpu.PrefetchScalarGridSpec(
            num_scalar_prefetch=0,
            grid=grid,
            in_specs=[
                pl.BlockSpec((1, Hin, Win, cin),
                             lambda g0, g1: (b_of(g0, g1), 0, 0, 0)),
                pl.BlockSpec((3, 3 * cin, ct),
                             lambda g0, g1: (0, 0, j_of(g0, g1))),
                pl.BlockSpec((1, ct),
                             lambda g0, g1: (0, j_of(g0, g1))),
            ],
            out_specs=pl.BlockSpec(
                (1, H, W, ct),
                lambda g0, g1: (b_of(g0, g1), 0, 0, j_of(g0, g1))),
            scratch_shapes=scratch,
        ),
        compiler_params=pltpu.CompilerParams(
            dimension_semantics=sem,
            vmem_limit_bytes=_vmem_limit_bytes()),
    )(x, wt, b2)


# --------------------------------------------------------------------------- #
# VGG19 model
# --------------------------------------------------------------------------- #

_LAYER_NAMES = [
    "conv1_1", "conv1_2",
    "conv2_1", "conv2_2",
    "conv3_1", "conv3_2", "conv3_3", "conv3_4",
    "conv4_1", "conv4_2", "conv4_3", "conv4_4",
    "conv5_1", "conv5_2", "conv5_3", "conv5_4",
]

_CONV_CFG = [
    (3, 64), (64, 64),
    (64, 128), (128, 128),
    (128, 256), (256, 256), (256, 256), (256, 256),
    (256, 512), (512, 512), (512, 512), (512, 512),
    (512, 512), (512, 512), (512, 512), (512, 512),
]

# convs preceded by (ReLU + MaxPool2d) inside their block
_POOL_BEFORE = {2, 4, 8, 12}


def init_vgg19_params(key):
    params = []
    for cin, cout in _CONV_CFG:
        kw, kb, key = jax.random.split(key, 3)
        std = (2.0 / (9.0 * cin)) ** 0.5
        w = jax.random.normal(kw, (3, 3, cin, cout), jnp.float32) * std
        b = jax.random.normal(kb, (cout,), jnp.float32) * 0.01
        params.append((w, b))
    return params


def vgg19_forward(x_nchw, params, *, channels_last=False):
    """x_nchw: (N, 3, H, W) f32.  Returns dict of pre-ReLU conv features.

    channels_last=False (default): NCHW f32 features matching the PyTorch
    module (one fused transpose+cast per feature, deferred to the very end).
    channels_last=True: raw NHWC bf16 feature maps (no extra HBM pass).
    """
    h = jnp.transpose(x_nchw, (0, 2, 3, 1)).astype(jnp.bfloat16)
    feats = {}
    for i, name in enumerate(_LAYER_NAMES):
        w, b = params[i]
        if i == 0:
            h = conv3x3_cin3(h, w, b)
        else:
            h = conv3x3_block(h, w, b,
                              relu_input=True,
                              pool_input=(i in _POOL_BEFORE))
        feats[name] = h
    if channels_last:
        return feats
    return {k: jnp.transpose(v, (0, 3, 1, 2)).astype(jnp.float32)
            for k, v in feats.items()}


# --------------------------------------------------------------------------- #
# Pure-XLA reference (same bf16 rounding points) for a numerical sanity check
# --------------------------------------------------------------------------- #

def _reference_features(x_nchw, params):
    h = jnp.transpose(x_nchw, (0, 2, 3, 1)).astype(jnp.bfloat16)
    feats = {}
    for i, name in enumerate(_LAYER_NAMES):
        w, b = params[i]
        if i > 0:
            h = jax.nn.relu(h)
        if i in _POOL_BEFORE:
            n, hh, ww, c = h.shape
            h = jnp.max(h.reshape(n, hh // 2, 2, ww // 2, 2, c), axis=(2, 4))
        y = lax.conv_general_dilated(
            h, w.astype(jnp.bfloat16), window_strides=(1, 1), padding="SAME",
            dimension_numbers=("NHWC", "HWIO", "NHWC"),
            preferred_element_type=jnp.float32) + b.reshape(1, 1, 1, -1)
        feats[name] = y          # f32, NHWC, pre-ReLU
        h = y.astype(jnp.bfloat16)
    return feats


if __name__ == "__main__":
    key = jax.random.PRNGKey(0)
    k_x, k_p = jax.random.split(key)
    # small spatial size (32x32) so block5 features are 2x2; channels=3 as VGG requires
    x = jax.random.normal(k_x, (2, 3, 32, 32), jnp.float32)
    params = init_vgg19_params(k_p)

    feats = jax.block_until_ready(vgg19_forward(x, params))

    # shapes follow the VGG19 feature pyramid
    assert feats["conv1_1"].shape == (2, 64, 32, 32)
    assert feats["conv2_2"].shape == (2, 128, 16, 16)
    assert feats["conv3_4"].shape == (2, 256, 8, 8)
    assert feats["conv4_4"].shape == (2, 512, 4, 4)
    assert feats["conv5_4"].shape == (2, 512, 2, 2)
    assert len(feats) == 16

    # numerical check against a pure-XLA reference with matching bf16 rounding
    ref = _reference_features(x, params)
    for name in _LAYER_NAMES:
        a = feats[name].astype(jnp.float32)
        r = jnp.transpose(ref[name], (0, 3, 1, 2)).astype(jnp.float32)
        err = jnp.linalg.norm((a - r).ravel()) / (jnp.linalg.norm(r.ravel()) + 1e-6)
        assert float(err) < 0.05, (name, float(err))

    print("KERNEL_OK")
</pallas_src>

<mosaic_0001>
module attributes {stable_mosaic.version = 11 : i64} {
  func.func @_dense_conv_kernel(%arg0: i32, %arg1: i32, %arg2: memref<1x32x32x27xbf16, #tpu.memory_space<vmem>>, %arg3: memref<27x64xbf16, #tpu.memory_space<vmem>>, %arg4: memref<1x64xf32, #tpu.memory_space<vmem>>, %arg5: memref<1x32x32x64xbf16, #tpu.memory_space<vmem>>) attributes {dimension_semantics = [#tpu.dimension_semantics<parallel>, #tpu.dimension_semantics<parallel>], iteration_bounds = array<i64: 2, 1>, scalar_prefetch = 0 : i64, scratch_operands = 0 : i64, tpu.core_type = #tpu.core_type<tc>, window_params = [{transform_indices = @transform_0, window_bounds = array<i64: 1, 32, 32, 27>}, {pipeline_mode = #tpu.pipeline_mode<synchronous>, transform_indices = @transform_1, window_bounds = array<i64: 27, 64>}, {pipeline_mode = #tpu.pipeline_mode<synchronous>, transform_indices = @transform_2, window_bounds = array<i64: 1, 64>}, {transform_indices = @transform_3, window_bounds = array<i64: 1, 32, 32, 64>}]} {
    %c0 = arith.constant 0 : index
    %c0_0 = arith.constant 0 : index
    %0 = vector.load %arg3[%c0, %c0_0] : memref<27x64xbf16, #tpu.memory_space<vmem>>, vector<27x64xbf16>
    %c0_1 = arith.constant 0 : index
    %c0_2 = arith.constant 0 : index
    %1 = vector.load %arg4[%c0_1, %c0_2] : memref<1x64xf32, #tpu.memory_space<vmem>>, vector<1x64xf32>
    %c0_3 = arith.constant 0 : index
    %c0_4 = arith.constant 0 : index
    %c0_5 = arith.constant 0 : index
    %c0_6 = arith.constant 0 : index
    %2 = vector.load %arg2[%c0_3, %c0_4, %c0_5, %c0_6] : memref<1x32x32x27xbf16, #tpu.memory_space<vmem>>, vector<1x32x32x27xbf16>
    %3 = vector.shape_cast %2 : vector<1x32x32x27xbf16> to vector<32x32x27xbf16>
    %4 = vector.shape_cast %3 : vector<32x32x27xbf16> to vector<1024x27xbf16>
    %cst = arith.constant dense<0.000000e+00> : vector<1024x64xf32>
    %5 = tpu.matmul %4, %0, %cst {dimension_numbers = #tpu.dot_dimension_numbers<[1], [0], [0], [1], [0, 0, 1, 1], [], []>} : vector<1024x27xbf16>, vector<27x64xbf16>, vector<1024x64xf32> -> vector<1024x64xf32>
    %6 = vector.broadcast %1 : vector<1x64xf32> to vector<1024x64xf32>
    %7 = arith.addf %5, %6 : vector<1024x64xf32>
    %8 = vector.shape_cast %7 : vector<1024x64xf32> to vector<32x32x64xf32>
    %9 = arith.truncf %8 : vector<32x32x64xf32> to vector<32x32x64xbf16>
    %c0_7 = arith.constant 0 : index
    %c0_8 = arith.constant 0 : index
    %c0_9 = arith.constant 0 : index
    %c0_10 = arith.constant 0 : index
    %10 = vector.load %arg5[%c0_7, %c0_8, %c0_9, %c0_10] : memref<1x32x32x64xbf16, #tpu.memory_space<vmem>>, vector<1x32x32x64xbf16>
    %11 = vector.shape_cast %10 : vector<1x32x32x64xbf16> to vector<32x32x64xbf16>
    %12 = vector.shape_cast %9 : vector<32x32x64xbf16> to vector<1x32x32x64xbf16>
    tpu.vector_store %arg5[%c0_7, %c0_8, %c0_9, %c0_10], %12 {strides = array<i32>} : memref<1x32x32x64xbf16, #tpu.memory_space<vmem>>, vector<1x32x32x64xbf16>,
    return
  }
  func.func @transform_0(%arg0: i32, %arg1: i32) -> (i32, i32, i32, i32) {
    %c0_i32 = arith.constant 0 : i32
    %c0_i32_0 = arith.constant 0 : i32
    %c0_i32_1 = arith.constant 0 : i32
    return %arg0, %arg1, %c0_i32, %c0_i32_0 : i32, i32, i32, i32
  }
  func.func @transform_1(%arg0: i32, %arg1: i32) -> (i32, i32) {
    %c0_i32 = arith.constant 0 : i32
    %c0_i32_0 = arith.constant 0 : i32
    %c0_i32_1 = arith.constant 0 : i32
    return %c0_i32, %c0_i32_0 : i32, i32
  }
  func.func @transform_2(%arg0: i32, %arg1: i32) -> (i32, i32) {
    %c0_i32 = arith.constant 0 : i32
    %c0_i32_0 = arith.constant 0 : i32
    %c0_i32_1 = arith.constant 0 : i32
    return %c0_i32, %c0_i32_0 : i32, i32
  }
  func.func @transform_3(%arg0: i32, %arg1: i32) -> (i32, i32, i32, i32) {
    %c0_i32 = arith.constant 0 : i32
    %c0_i32_0 = arith.constant 0 : i32
    %c0_i32_1 = arith.constant 0 : i32
    return %arg0, %arg1, %c0_i32, %c0_i32_0 : i32, i32, i32, i32
  }
}

</mosaic_0001>

<bundles_post_ra>
// kernel: tpu_custom_call.1
= control target key start
LH: loop header
LB: loop body
LE: loop exit
PB: predicated region body
PF: predicated region fallthrough
CT: control target
= control target key end

     0   :  { %8 = vsyncpa [#allocation3], 0  ;;  %s3635_s0 = inlined_call_operand.vmem [shape: bf16[2,32,32,27], index: 0, kind: input, shape index: {}]   ;;  %s3636_s1 = inlined_call_operand.vmem [shape: bf16[27,64], index: 1, kind: input, shape index: {}]   ;;  %s3637_s2 = inlined_call_operand.vmem [shape: f32[1,64], index: 2, kind: input, shape index: {}]   ;;  %s3638_s3 = inlined_call_operand.hbm [shape: bf16[2,32,32,64], index: 3, kind: output, shape index: {}]  }
   0x1   :  { %10 = vsyncpa [#allocation3 + $0x1], 0  ;;  %s2989_s12 = smov 0   ;;  %s2991_s13 = smov 0  }
   0x2   :  { %s2993_s14 = smov 0   ;;  %s2995_s15 = smov 0  }
   0x3   :  { %s2997_s16 = smov 0   ;;  %s2999_s17 = smov 0  }
   0x4 LB: > { %s2159_s18 = sadd.s32 4294967295, %s2963_s17   ;;  %s2160_s19 = sadd.s32 4294967294, %s2963_s17   ;;  %s2963_s17 = sphi %s2999_s17, %s16_s17   ;;  %s2959_s16 = sphi %s2997_s16, %s3645_s16   ;;  %s2955_s15 = sphi %s2995_s15, %s3644_s15   ;;  %s2951_s14 = sphi %s2993_s14, %s3643_s14   ;;  %s2947_s13 = sphi %s2991_s13, %s3642_s13   ;;  %s2943_s12 = sphi %s2989_s12, %s3641_s12  }
   0x5   : > { %s28_s20 = sadd.s32 1, %s2959_s16  ;;  %s107_s21 = sadd.s32 1, %s2951_s14 }
   0x6   : > { %p30_p0 = scmp.ge.s32.totalorder %s28_s20, 2  ;;  %p117_p1 = scmp.ne.s32.totalorder %s2951_s14, %s2947_s13 }
   0x7   : > { %p118_p2 = scmp.eq.s32.totalorder %s2159_s18, 1  ;;  %p123_p3 = scmp.ne.s32.totalorder %s2947_s13, %s2943_s12 }
   0x8   : > { %s3647_s20 = smov (%p30_p0, %s28_s20), 0  ;;  %p124_p5 = scmp.eq.s32.totalorder %s2160_s19, 1 }
   0x9   : > { %p3029_p4 = por %p118_p2, %p117_p1  ;;  %s102_s23 = ssub.s32 %s2959_s16, %s3647_s20 }
   0xa   : > { %p2163_p6 = scmp.ge.s32.totalorder %s2963_s17, 1  ;;  %p105_p7 = scmp.eq.s32.totalorder %s102_s23, 0 }
   0xb   : > { %p3036_p8 = por %p124_p5, %p123_p3  ;;  %p162_p9 = scmp.lt.s32.totalorder %s2963_s17, 3 }
   0xc   : > { %s3042_s25 = scalar_select %p105_p7, %s2951_s14, %s107_s21  }
   0xd   : > { %p163_p10 = pnand %p2163_p6, %p162_p9 }
   0xe   : > { %p192_p11 = scmp.lt.s32.totalorder (!%p163_p10), %s2955_s15, 1  ;;  %s188_s8 = sand.u32 (!%p163_p10), 1, %s2947_s13  }
   0xf   : > { %166 = sbr.rel (%p163_p10) target bundleno = 370 (0x172), region = 32  ;;  %s2164_s11 = sshll.u32 (!%p163_p10), %s188_s8, 9 }
  0x10   : > { %s3197_s18 = scalar_lea.vmem (!%p163_p10), [#allocation2], %s2164_s11  ;;  %s2560_s19 = sshll.u32 (!%p163_p10), %s2955_s15, 13 }
  0x11   : > { %s2077_s21 = sshll.u32 (!%p163_p10), %s3197_s18, 4  ;;  %s3590_s27 = scalar_lea.sflag (!%p163_p10), [#allocation3], %s188_s8  ;;  %s3578_s21 = int_to_ptr.vmem [resolvable:$true] %s2077_s21 }
  0x12   : > { %s2887_s28 = scalar_lea.vmem (!%p163_p10), %s3578_s21, 8192  ;;  %s2966_s29 = smov (!%p163_p10), [#allocation2]  }
  0x13   : > { %p2888_p12 = scmp.ne.s32.totalorder (!%p163_p10), %s3578_s21, %s2887_s28 }
  0x14   : > { %v2821_v0 = vld [vmem:[%s3636_s1 + $0x8] sm:$0x3f]   ;;  %vm867_vm0 = vcmask 1044480   ;;  %vm868_vm1 = vcmask 1045504   ;;  %v2965_v1 = vmov 65535   ;;  %v2822_v5 = vld [vmem:[%s3636_s1] sm:$0xff]  }
  0x15   : > { %v869_v2 = vsel %vm867_vm0, 4294967295, %v2965_v1  ;;  %s193_s30 = scalar_select %p192_p11, %s2955_s15, 1  ;;  %vm674_vm2 = vcmask 220160   ;;  %vm1931_vm3 = vcmask 519168  }
  0x16   : > { %v870_v3 = vsel %vm868_vm1, %v869_v2, 0  ;;  %s3576_s15 = scalar_lea.hbm %s3638_s3, %s2560_s19  ;;  %p2889_p13 = pnand %p2888_p12, %p3029_p4 }
  0x17   : > { %v872_v4 = vand.u32 %v2821_v0, %v870_v3  ;;  %s2431_s4 = sshll.u32 %s193_s30, 9  ;;  %s2891_s30 = sshll.u32 %s2966_s29, 4  ;;  %s2892_s30 = int_to_ptr.vmem [resolvable:$false] %s2891_s30 }
  0x18   : > { %s3055_s7 = scalar_lea.vmem %s3635_s0, %s2431_s4  ;;  %p2890_p0 = pneg %p2889_p13 }
  0x19   : > { %2627 = vmatprep.subr.bf16.mxu0 %v872_v4  ;;  %2759 = vmatprep.subr.bf16.mxu1 %v872_v4  ;;  %v2823_v6 = vld [vmem:[%s3055_s7] sm:$0xff]   ;;  %v2825_v8 = vld [vmem:[%s3055_s7 + $0x8] sm:$0xff]   ;;  %v2827_v10 = vld [vmem:[%s3055_s7 + $0x10] sm:$0xff]   ;;  %s2893_s4 = scalar_lea.vmem %s2892_s30, 16384  ;;  %p2894_p1 = scmp.lt.s32.totalorder %s3578_s21, %s2892_s30 }
  0x1a   : > { %2628 = vmatpush3.bf16.msra.mxu0 %v872_v4  ;;  %2761 = vmatpush3.bf16.msra.mxu1 %v872_v4  ;;  %v2824_v7 = vld [vmem:[%s3055_s7 + $0x100] sm:$0xff]   ;;  %v2826_v9 = vld [vmem:[%s3055_s7 + $0x108] sm:$0xff]   ;;  %v2828_v11 = vld [vmem:[%s3055_s7 + $0x110] sm:$0xff]   ;;  %p2895_p2 = scmp.lt.s32.totalorder %s2893_s4, %s2887_s28 }
  0x1b   : > { %2629 = vmatprep.subr.bf16.mxu0 %v2822_v5  ;;  %2760 = vmatprep.subr.bf16.mxu1 %v2822_v5  ;;  %v2829_v12 = vld [vmem:[%s3055_s7 + $0x18] sm:$0xff]   ;;  %v2831_v14 = vld [vmem:[%s3055_s7 + $0x20] sm:$0xff]   ;;  %v2833_v16 = vld [vmem:[%s3055_s7 + $0x28] sm:$0xff]  }
  0x1c   : > { %2631 = vmatprep.mubr.msk.bf16.mxu0 %vm674_vm2, %v2823_v6  ;;  %2695 = vmatprep.mubr.msk.bf16.mxu1 %vm674_vm2, %v2824_v7  ;;  %v2830_v13 = vld [vmem:[%s3055_s7 + $0x118] sm:$0xff]   ;;  %v2832_v15 = vld [vmem:[%s3055_s7 + $0x120] sm:$0xff]   ;;  %v2834_v17 = vld [vmem:[%s3055_s7 + $0x128] sm:$0xff]   ;;  %p2896_p3 = por %p2895_p2, %p2894_p1 }
  0x1d   : > { %v2835_v18 = vld [vmem:[%s3055_s7 + $0x30] sm:$0xff]   ;;  %v2837_v20 = vld [vmem:[%s3055_s7 + $0x38] sm:$0xff]   ;;  %v2839_v22 = vld [vmem:[%s3055_s7 + $0x40] sm:$0xff]  }
  0x1e   : > { %2630 = vmatpush3.bf16.msra.mxu0 %v2822_v5  ;;  %2762 = vmatpush3.bf16.msra.mxu1 %v2822_v5  ;;  %v2836_v19 = vld [vmem:[%s3055_s7 + $0x130] sm:$0xff]   ;;  %v2838_v21 = vld [vmem:[%s3055_s7 + $0x138] sm:$0xff]   ;;  %v2840_v23 = vld [vmem:[%s3055_s7 + $0x140] sm:$0xff]   ;;  %p2897_p5 = pnand %p2896_p3, %p2890_p0 }
  0x1f   : > { %v2841_v24 = vld [vmem:[%s3055_s7 + $0x48] sm:$0xff]   ;;  %v2843_v26 = vld [vmem:[%s3055_s7 + $0x50] sm:$0xff]   ;;  %v2845_v28 = vld [vmem:[%s3055_s7 + $0x58] sm:$0xff]  }
  0x20   : > { %v2842_v25 = vld [vmem:[%s3055_s7 + $0x148] sm:$0xff]   ;;  %v2844_v27 = vld [vmem:[%s3055_s7 + $0x150] sm:$0xff]   ;;  %v2846_v29 = vld [vmem:[%s3055_s7 + $0x158] sm:$0xff]  }
  0x21   : > { %2632 = vmatmul.mubr.msk.bf16.vlgmr.msra.gmra.mxu0 %vm674_vm2, %v2825_v8  ;;  %2696 = vmatmul.mubr.msk.bf16.vlgmr.msra.gmra.mxu1 %vm674_vm2, %v2826_v9  ;;  %v2847_v30 = vld [vmem:[%s3055_s7 + $0x60] sm:$0xff]   ;;  %v2849_v32 = vld [vmem:[%s3055_s7 + $0x68] sm:$0xff]   ;;  %v2851_v34 = vld [vmem:[%s3055_s7 + $0x70] sm:$0xff]  }
  0x22   : > { %2635 = vmatprep.mubr.msk.bf16.mxu0 %vm674_vm2, %v2827_v10  ;;  %2699 = vmatprep.mubr.msk.bf16.mxu1 %vm674_vm2, %v2828_v11  ;;  %v2848_v31 = vld [vmem:[%s3055_s7 + $0x160] sm:$0xff]   ;;  %v2850_v33 = vld [vmem:[%s3055_s7 + $0x168] sm:$0xff]   ;;  %v2852_v35 = vld [vmem:[%s3055_s7 + $0x170] sm:$0xff]  }
  0x23   : > { %v2853_v36 = vld [vmem:[%s3055_s7 + $0x78] sm:$0xff]   ;;  %v2855_v38 = vld [vmem:[%s3055_s7 + $0x80] sm:$0xff]   ;;  %v2857_v40 = vld [vmem:[%s3055_s7 + $0x88] sm:$0xff]  }
  0x24   : > { %v2854_v37 = vld [vmem:[%s3055_s7 + $0x178] sm:$0xff]   ;;  %v2856_v39 = vld [vmem:[%s3055_s7 + $0x180] sm:$0xff]   ;;  %v2858_v41 = vld [vmem:[%s3055_s7 + $0x188] sm:$0xff]  }
  0x25   : > { %v2859_v42 = vld [vmem:[%s3055_s7 + $0x90] sm:$0xff]   ;;  %v2861_v44 = vld [vmem:[%s3055_s7 + $0x98] sm:$0xff]   ;;  %v2863_v46 = vld [vmem:[%s3055_s7 + $0xa0] sm:$0xff]  }
  0x26   : > { %v2860_v43 = vld [vmem:[%s3055_s7 + $0x190] sm:$0xff]   ;;  %v2862_v45 = vld [vmem:[%s3055_s7 + $0x198] sm:$0xff]   ;;  %v2864_v47 = vld [vmem:[%s3055_s7 + $0x1a0] sm:$0xff]  }
  0x27   : > { %v2865_v48 = vld [vmem:[%s3055_s7 + $0xa8] sm:$0xff]   ;;  %v2867_v50 = vld [vmem:[%s3055_s7 + $0xb0] sm:$0xff]   ;;  %v2869_v52 = vld [vmem:[%s3055_s7 + $0xb8] sm:$0xff]  }
  0x28   : > { %v2866_v49 = vld [vmem:[%s3055_s7 + $0x1a8] sm:$0xff]   ;;  %v2868_v51 = vld [vmem:[%s3055_s7 + $0x1b0] sm:$0xff]   ;;  %v2870_v53 = vld [vmem:[%s3055_s7 + $0x1b8] sm:$0xff]  }
  0x29   : > { %2636 = vmatmul.mubr.msk.bf16.gmra.mxu0 %vm674_vm2, %v2829_v12  ;;  %2700 = vmatmul.mubr.msk.bf16.gmra.mxu1 %vm674_vm2, %v2830_v13  ;;  %v2871_v54 = vld [vmem:[%s3055_s7 + $0xc0] sm:$0xff]   ;;  %v2873_v56 = vld [vmem:[%s3055_s7 + $0xc8] sm:$0xff]   ;;  %v2875_v58 = vld [vmem:[%s3055_s7 + $0xd0] sm:$0xff]  }
  0x2a   : > { %2639 = vmatprep.mubr.msk.bf16.mxu0 %vm674_vm2, %v2831_v14  ;;  %2703 = vmatprep.mubr.msk.bf16.mxu1 %vm674_vm2, %v2832_v15  ;;  %v2872_v55 = vld [vmem:[%s3055_s7 + $0x1c0] sm:$0xff]   ;;  %v2874_v57 = vld [vmem:[%s3055_s7 + $0x1c8] sm:$0xff]   ;;  %v2876_v59 = vld [vmem:[%s3055_s7 + $0x1d0] sm:$0xff]  }
  0x2b   : > { %v2877_v60 = vld [vmem:[%s3055_s7 + $0xd8] sm:$0xff]   ;;  %v2879_v62 = vld [vmem:[%s3055_s7 + $0xe0] sm:$0xff]   ;;  %v2881_v0 = vld [vmem:[%s3055_s7 + $0xe8] sm:$0xff]  }
  0x2c   : > { %v2878_v61 = vld [vmem:[%s3055_s7 + $0x1d8] sm:$0xff]   ;;  %v2880_v63 = vld [vmem:[%s3055_s7 + $0x1e0] sm:$0xff]   ;;  %v2882_v1 = vld [vmem:[%s3055_s7 + $0x1e8] sm:$0xff]  }
  0x2d   : > { %v2883_v2 = vld [vmem:[%s3055_s7 + $0xf0] sm:$0xff]   ;;  %v2885_v4 = vld [vmem:[%s3055_s7 + $0xf8] sm:$0xff]   ;;  %v3189_v6 = vld [vmem:[%s3637_s2] ss:$0 sm:$0xff] }
  0x2e   : > { %v2884_v3 = vld [vmem:[%s3055_s7 + $0x1f0] sm:$0xff]   ;;  %v2886_v5 = vld [vmem:[%s3055_s7 + $0x1f8] sm:$0xff]  }
  0x31   : > { %2640 = vmatmul.mubr.msk.bf16.gmra.mxu0 %vm674_vm2, %v2833_v16  ;;  %2704 = vmatmul.mubr.msk.bf16.gmra.mxu1 %vm674_vm2, %v2834_v17 }
  0x32   : > { %2643 = vmatprep.mubr.msk.bf16.mxu0 %vm674_vm2, %v2835_v18  ;;  %2707 = vmatprep.mubr.msk.bf16.mxu1 %vm674_vm2, %v2836_v19 }
  0x39   : > { %2644 = vmatmul.mubr.msk.bf16.gmra.mxu0 %vm674_vm2, %v2837_v20  ;;  %2708 = vmatmul.mubr.msk.bf16.gmra.mxu1 %vm674_vm2, %v2838_v21 }
  0x3a   : > { %2647 = vmatprep.mubr.msk.bf16.mxu0 %vm674_vm2, %v2839_v22  ;;  %2711 = vmatprep.mubr.msk.bf16.mxu1 %vm674_vm2, %v2840_v23 }
  0x41   : > { %2648 = vmatmul.mubr.msk.bf16.gmra.mxu0 %vm674_vm2, %v2841_v24  ;;  %2712 = vmatmul.mubr.msk.bf16.gmra.mxu1 %vm674_vm2, %v2842_v25 }
  0x42   : > { %2651 = vmatprep.mubr.msk.bf16.mxu0 %vm674_vm2, %v2843_v26  ;;  %2715 = vmatprep.mubr.msk.bf16.mxu1 %vm674_vm2, %v2844_v27 }
  0x49   : > { %2652 = vmatmul.mubr.msk.bf16.gmra.mxu0 %vm674_vm2, %v2845_v28  ;;  %2716 = vmatmul.mubr.msk.bf16.gmra.mxu1 %vm674_vm2, %v2846_v29 }
  0x4a   : > { %2655 = vmatprep.mubr.msk.bf16.mxu0 %vm674_vm2, %v2847_v30  ;;  %2719 = vmatprep.mubr.msk.bf16.mxu1 %vm674_vm2, %v2848_v31 }
  0x51   : > { %2656 = vmatmul.mubr.msk.bf16.gmra.mxu0 %vm674_vm2, %v2849_v32  ;;  %2720 = vmatmul.mubr.msk.bf16.gmra.mxu1 %vm674_vm2, %v2850_v33 }
  0x52   : > { %2659 = vmatprep.mubr.msk.bf16.mxu0 %vm674_vm2, %v2851_v34  ;;  %2723 = vmatprep.mubr.msk.bf16.mxu1 %vm674_vm2, %v2852_v35 }
  0x59   : > { %2660 = vmatmul.mubr.msk.bf16.gmra.mxu0 %vm674_vm2, %v2853_v36  ;;  %2724 = vmatmul.mubr.msk.bf16.gmra.mxu1 %vm674_vm2, %v2854_v37 }
  0x5a   : > { %2663 = vmatprep.mubr.msk.bf16.mxu0 %vm674_vm2, %v2855_v38  ;;  %2727 = vmatprep.mubr.msk.bf16.mxu1 %vm674_vm2, %v2856_v39 }
  0x61   : > { %2664 = vmatmul.mubr.msk.bf16.gmra.mxu0 %vm674_vm2, %v2857_v40  ;;  %2728 = vmatmul.mubr.msk.bf16.gmra.mxu1 %vm674_vm2, %v2858_v41 }
  0x62   : > { %2667 = vmatprep.mubr.msk.bf16.mxu0 %vm674_vm2, %v2859_v42  ;;  %2731 = vmatprep.mubr.msk.bf16.mxu1 %vm674_vm2, %v2860_v43 }
  0x69   : > { %2668 = vmatmul.mubr.msk.bf16.gmra.mxu0 %vm674_vm2, %v2861_v44  ;;  %2732 = vmatmul.mubr.msk.bf16.gmra.mxu1 %vm674_vm2, %v2862_v45 }
  0x6a   : > { %2671 = vmatprep.mubr.msk.bf16.mxu0 %vm674_vm2, %v2863_v46  ;;  %2735 = vmatprep.mubr.msk.bf16.mxu1 %vm674_vm2, %v2864_v47 }
  0x71   : > { %2672 = vmatmul.mubr.msk.bf16.gmra.mxu0 %vm674_vm2, %v2865_v48  ;;  %2736 = vmatmul.mubr.msk.bf16.gmra.mxu1 %vm674_vm2, %v2866_v49 }
  0x72   : > { %2675 = vmatprep.mubr.msk.bf16.mxu0 %vm674_vm2, %v2867_v50  ;;  %2739 = vmatprep.mubr.msk.bf16.mxu1 %vm674_vm2, %v2868_v51 }
  0x79   : > { %2676 = vmatmul.mubr.msk.bf16.gmra.mxu0 %vm674_vm2, %v2869_v52  ;;  %2740 = vmatmul.mubr.msk.bf16.gmra.mxu1 %vm674_vm2, %v2870_v53 }
  0x7a   : > { %2679 = vmatprep.mubr.msk.bf16.mxu0 %vm674_vm2, %v2871_v54  ;;  %2743 = vmatprep.mubr.msk.bf16.mxu1 %vm674_vm2, %v2872_v55 }
  0x81   : > { %2680 = vmatmul.mubr.msk.bf16.gmra.mxu0 %vm674_vm2, %v2873_v56  ;;  %2744 = vmatmul.mubr.msk.bf16.gmra.mxu1 %vm674_vm2, %v2874_v57 }
  0x82   : > { %2683 = vmatprep.mubr.msk.bf16.mxu0 %vm674_vm2, %v2875_v58  ;;  %2747 = vmatprep.mubr.msk.bf16.mxu1 %vm674_vm2, %v2876_v59 }
  0x89   : > { %2684 = vmatmul.mubr.msk.bf16.gmra.mxu0 %vm674_vm2, %v2877_v60  ;;  %2748 = vmatmul.mubr.msk.bf16.gmra.mxu1 %vm674_vm2, %v2878_v61 }
  0x8a   : > { %2687 = vmatprep.mubr.msk.bf16.mxu0 %vm674_vm2, %v2879_v62  ;;  %2751 = vmatprep.mubr.msk.bf16.mxu1 %vm674_vm2, %v2880_v63 }
  0x91   : > { %2688 = vmatmul.mubr.msk.bf16.gmra.mxu0 %vm674_vm2, %v2881_v0  ;;  %2752 = vmatmul.mubr.msk.bf16.gmra.mxu1 %vm674_vm2, %v2882_v1 }
  0x92   : > { %2691 = vmatprep.mubr.msk.bf16.mxu0 %vm674_vm2, %v2883_v2  ;;  %2755 = vmatprep.mubr.msk.bf16.mxu1 %vm674_vm2, %v2884_v3 }
  0x99   : > { %2692 = vmatmul.mubr.msk.bf16.gmra.mxu0 %vm674_vm2, %v2885_v4  ;;  %2756 = vmatmul.mubr.msk.bf16.gmra.mxu1 %vm674_vm2, %v2886_v5 }
  0xe1   : > { %v2633_v7 = vpop.f32.mrf.mxu0  ;;  %v2697_v8 = vpop.f32.mrf.mxu1 }
  0xe2   : > { %v917_v9 = vadd.f32 %v2633_v7, %v3189_v6  ;;  %v1173_v10 = vadd.f32 %v2697_v8, %v3189_v6 }
  0xe3   : > { %v908_v11 = vpop.f32.mrf.mxu0  ;;  %v1164_v12 = vpop.f32.mrf.mxu1 }
  0xe4   : > { %v2434_v13 = vpack.c.bf16 %v917_v9, %v917_v9  ;;  %v2498_v14 = vpack.c.bf16 %v1173_v10, %v1173_v10  ;;  %v909_v15 = vadd.f32 %v3189_v6, %v908_v11  ;;  %v1165_v16 = vadd.f32 %v3189_v6, %v1164_v12 }
  0xe5   : > { %v2634_v17 = vpop.f32.mrf.mxu0  ;;  %v2698_v18 = vpop.f32.mrf.mxu1 }
  0xe6   : > { %1934 = vst.msk [vmem:[%s3197_s18 + $0x8] sm:$0xf] %vm1931_vm3, %v2434_v13  ;;  %1998 = vst.msk [vmem:[%s3197_s18 + $0x108] sm:$0xf] %vm1931_vm3, %v2498_v14  ;;  %v2432_v19 = vpack.c.bf16 %v909_v15, %v909_v15  ;;  %v2496_v20 = vpack.c.bf16 %v1165_v16, %v1165_v16  ;;  %v920_v21 = vadd.f32 %v2634_v17, %v3189_v6 }
  0xe7   : > { %v1176_v22 = vadd.f32 %v2698_v18, %v3189_v6  ;;  %v911_v23 = vpop.f32.mrf.mxu0  ;;  %v1167_v24 = vpop.f32.mrf.mxu1 }
  0xe8   : > { %1932 = vst.msk [vmem:[%s3197_s18] sm:$0xf] %vm1931_vm3, %v2432_v19  ;;  %1996 = vst.msk [vmem:[%s3197_s18 + $0x100] sm:$0xf] %vm1931_vm3, %v2496_v20  ;;  %v2435_v25 = vpack.c.bf16 %v920_v21, %v920_v21  ;;  %v912_v27 = vadd.f32 %v3189_v6, %v911_v23  ;;  %v1168_v28 = vadd.f32 %v3189_v6, %v1167_v24 }
  0xe9   : > { %v2499_v26 = vpack.c.bf16 %v1176_v22, %v1176_v22  ;;  %v2637_v29 = vpop.f32.mrf.mxu0  ;;  %v2701_v30 = vpop.f32.mrf.mxu1 }
  0xea   : > { %1935 = vst.msk [vmem:[%s3197_s18 + $0xc] sm:$0xf] %vm1931_vm3, %v2435_v25  ;;  %v2433_v31 = vpack.c.bf16 %v912_v27, %v912_v27  ;;  %v2497_v32 = vpack.c.bf16 %v1168_v28, %v1168_v28  ;;  %v933_v33 = vadd.f32 %v2637_v29, %v3189_v6  ;;  %v1189_v34 = vadd.f32 %v2701_v30, %v3189_v6 }
  0xeb   : > { %1999 = vst.msk [vmem:[%s3197_s18 + $0x10c] sm:$0xf] %vm1931_vm3, %v2499_v26  ;;  %v924_v35 = vpop.f32.mrf.mxu0  ;;  %v1180_v36 = vpop.f32.mrf.mxu1 }
  0xec   : > { %1933 = vst.msk [vmem:[%s3197_s18 + $0x4] sm:$0xf] %vm1931_vm3, %v2433_v31  ;;  %1997 = vst.msk [vmem:[%s3197_s18 + $0x104] sm:$0xf] %vm1931_vm3, %v2497_v32  ;;  %v2438_v37 = vpack.c.bf16 %v933_v33, %v933_v33  ;;  %v2502_v38 = vpack.c.bf16 %v1189_v34, %v1189_v34  ;;  %v925_v39 = vadd.f32 %v3189_v6, %v924_v35 }
  0xed   : > { %v1181_v40 = vadd.f32 %v3189_v6, %v1180_v36  ;;  %v2638_v41 = vpop.f32.mrf.mxu0  ;;  %v2702_v42 = vpop.f32.mrf.mxu1 }
  0xee   : > { %1938 = vst.msk [vmem:[%s3197_s18 + $0x18] sm:$0xf] %vm1931_vm3, %v2438_v37  ;;  %2002 = vst.msk [vmem:[%s3197_s18 + $0x118] sm:$0xf] %vm1931_vm3, %v2502_v38  ;;  %v2436_v43 = vpack.c.bf16 %v925_v39, %v925_v39  ;;  %v936_v45 = vadd.f32 %v2638_v41, %v3189_v6  ;;  %v1192_v46 = vadd.f32 %v2702_v42, %v3189_v6 }
  0xef   : > { %v2500_v44 = vpack.c.bf16 %v1181_v40, %v1181_v40  ;;  %v927_v47 = vpop.f32.mrf.mxu0  ;;  %v1183_v48 = vpop.f32.mrf.mxu1 }
  0xf0   : > { %1936 = vst.msk [vmem:[%s3197_s18 + $0x10] sm:$0xf] %vm1931_vm3, %v2436_v43  ;;  %v2439_v49 = vpack.c.bf16 %v936_v45, %v936_v45  ;;  %v2503_v50 = vpack.c.bf16 %v1192_v46, %v1192_v46  ;;  %v928_v51 = vadd.f32 %v3189_v6, %v927_v47  ;;  %v1184_v52 = vadd.f32 %v3189_v6, %v1183_v48 }
  0xf1   : > { %2000 = vst.msk [vmem:[%s3197_s18 + $0x110] sm:$0xf] %vm1931_vm3, %v2500_v44  ;;  %v2641_v53 = vpop.f32.mrf.mxu0  ;;  %v2705_v54 = vpop.f32.mrf.mxu1 }
  0xf2   : > { %1939 = vst.msk [vmem:[%s3197_s18 + $0x1c] sm:$0xf] %vm1931_vm3, %v2439_v49  ;;  %2003 = vst.msk [vmem:[%s3197_s18 + $0x11c] sm:$0xf] %vm1931_vm3, %v2503_v50  ;;  %v2437_v55 = vpack.c.bf16 %v928_v51, %v928_v51  ;;  %v2501_v56 = vpack.c.bf16 %v1184_v52, %v1184_v52  ;;  %v949_v57 = vadd.f32 %v2641_v53, %v3189_v6 }
  0xf3   : > { %v1205_v58 = vadd.f32 %v2705_v54, %v3189_v6  ;;  %v940_v59 = vpop.f32.mrf.mxu0  ;;  %v1196_v60 = vpop.f32.mrf.mxu1 }
  0xf4   : > { %1937 = vst.msk [vmem:[%s3197_s18 + $0x14] sm:$0xf] %vm1931_vm3, %v2437_v55  ;;  %2001 = vst.msk [vmem:[%s3197_s18 + $0x114] sm:$0xf] %vm1931_vm3, %v2501_v56  ;;  %v2442_v61 = vpack.c.bf16 %v949_v57, %v949_v57  ;;  %v941_v63 = vadd.f32 %v3189_v6, %v940_v59  ;;  %v1197_v0 = vadd.f32 %v3189_v6, %v1196_v60 }
  0xf5   : > { %v2506_v62 = vpack.c.bf16 %v1205_v58, %v1205_v58  ;;  %v2642_v1 = vpop.f32.mrf.mxu0  ;;  %v2706_v2 = vpop.f32.mrf.mxu1 }
  0xf6   : > { %1942 = vst.msk [vmem:[%s3197_s18 + $0x28] sm:$0xf] %vm1931_vm3, %v2442_v61  ;;  %v2440_v3 = vpack.c.bf16 %v941_v63, %v941_v63  ;;  %v2504_v4 = vpack.c.bf16 %v1197_v0, %v1197_v0  ;;  %v952_v5 = vadd.f32 %v2642_v1, %v3189_v6  ;;  %v1208_v7 = vadd.f32 %v2706_v2, %v3189_v6 }
  0xf7   : > { %2006 = vst.msk [vmem:[%s3197_s18 + $0x128] sm:$0xf] %vm1931_vm3, %v2506_v62  ;;  %v943_v8 = vpop.f32.mrf.mxu0  ;;  %v1199_v9 = vpop.f32.mrf.mxu1 }
  0xf8   : > { %1940 = vst.msk [vmem:[%s3197_s18 + $0x20] sm:$0xf] %vm1931_vm3, %v2440_v3  ;;  %2004 = vst.msk [vmem:[%s3197_s18 + $0x120] sm:$0xf] %vm1931_vm3, %v2504_v4  ;;  %v2443_v10 = vpack.c.bf16 %v952_v5, %v952_v5  ;;  %v2507_v11 = vpack.c.bf16 %v1208_v7, %v1208_v7  ;;  %v944_v12 = vadd.f32 %v3189_v6, %v943_v8 }
  0xf9   : > { %v1200_v13 = vadd.f32 %v3189_v6, %v1199_v9  ;;  %v2645_v14 = vpop.f32.mrf.mxu0  ;;  %v2709_v15 = vpop.f32.mrf.mxu1 }
  0xfa   : > { %1943 = vst.msk [vmem:[%s3197_s18 + $0x2c] sm:$0xf] %vm1931_vm3, %v2443_v10  ;;  %2007 = vst.msk [vmem:[%s3197_s18 + $0x12c] sm:$0xf] %vm1931_vm3, %v2507_v11  ;;  %v2441_v16 = vpack.c.bf16 %v944_v12, %v944_v12  ;;  %v965_v18 = vadd.f32 %v2645_v14, %v3189_v6  ;;  %v1221_v19 = vadd.f32 %v2709_v15, %v3189_v6 }
  0xfb   : > { %v2505_v17 = vpack.c.bf16 %v1200_v13, %v1200_v13  ;;  %v956_v20 = vpop.f32.mrf.mxu0  ;;  %v1212_v21 = vpop.f32.mrf.mxu1 }
  0xfc   : > { %1941 = vst.msk [vmem:[%s3197_s18 + $0x24] sm:$0xf] %vm1931_vm3, %v2441_v16  ;;  %v2446_v22 = vpack.c.bf16 %v965_v18, %v965_v18  ;;  %v2510_v23 = vpack.c.bf16 %v1221_v19, %v1221_v19  ;;  %v957_v24 = vadd.f32 %v3189_v6, %v956_v20  ;;  %v1213_v25 = vadd.f32 %v3189_v6, %v1212_v21 }
  0xfd   : > { %2005 = vst.msk [vmem:[%s3197_s18 + $0x124] sm:$0xf] %vm1931_vm3, %v2505_v17  ;;  %v2646_v26 = vpop.f32.mrf.mxu0  ;;  %v2710_v27 = vpop.f32.mrf.mxu1 }
  0xfe   : > { %1946 = vst.msk [vmem:[%s3197_s18 + $0x38] sm:$0xf] %vm1931_vm3, %v2446_v22  ;;  %2010 = vst.msk [vmem:[%s3197_s18 + $0x138] sm:$0xf] %vm1931_vm3, %v2510_v23  ;;  %v2444_v28 = vpack.c.bf16 %v957_v24, %v957_v24  ;;  %v2508_v29 = vpack.c.bf16 %v1213_v25, %v1213_v25  ;;  %v968_v30 = vadd.f32 %v2646_v26, %v3189_v6 }
  0xff   : > { %v1224_v31 = vadd.f32 %v2710_v27, %v3189_v6  ;;  %v959_v32 = vpop.f32.mrf.mxu0  ;;  %v1215_v33 = vpop.f32.mrf.mxu1 }
 0x100   : > { %1944 = vst.msk [vmem:[%s3197_s18 + $0x30] sm:$0xf] %vm1931_vm3, %v2444_v28  ;;  %2008 = vst.msk [vmem:[%s3197_s18 + $0x130] sm:$0xf] %vm1931_vm3, %v2508_v29  ;;  %v2447_v34 = vpack.c.bf16 %v968_v30, %v968_v30  ;;  %v960_v36 = vadd.f32 %v3189_v6, %v959_v32  ;;  %v1216_v37 = vadd.f32 %v3189_v6, %v1215_v33 }
 0x101   : > { %v2511_v35 = vpack.c.bf16 %v1224_v31, %v1224_v31  ;;  %v2649_v38 = vpop.f32.mrf.mxu0  ;;  %v2713_v39 = vpop.f32.mrf.mxu1 }
 0x102   : > { %1947 = vst.msk [vmem:[%s3197_s18 + $0x3c] sm:$0xf] %vm1931_vm3, %v2447_v34  ;;  %v2445_v40 = vpack.c.bf16 %v960_v36, %v960_v36  ;;  %v2509_v41 = vpack.c.bf16 %v1216_v37, %v1216_v37  ;;  %v981_v42 = vadd.f32 %v2649_v38, %v3189_v6  ;;  %v1237_v43 = vadd.f32 %v2713_v39, %v3189_v6 }
 0x103   : > { %2011 = vst.msk [vmem:[%s3197_s18 + $0x13c] sm:$0xf] %vm1931_vm3, %v2511_v35  ;;  %v972_v44 = vpop.f32.mrf.mxu0  ;;  %v1228_v45 = vpop.f32.mrf.mxu1 }
 0x104   : > { %1945 = vst.msk [vmem:[%s3197_s18 + $0x34] sm:$0xf] %vm1931_vm3, %v2445_v40  ;;  %2009 = vst.msk [vmem:[%s3197_s18 + $0x134] sm:$0xf] %vm1931_vm3, %v2509_v41  ;;  %v2450_v46 = vpack.c.bf16 %v981_v42, %v981_v42  ;;  %v2514_v47 = vpack.c.bf16 %v1237_v43, %v1237_v43  ;;  %v973_v48 = vadd.f32 %v3189_v6, %v972_v44 }
 0x105   : > { %v1229_v49 = vadd.f32 %v3189_v6, %v1228_v45  ;;  %v2650_v50 = vpop.f32.mrf.mxu0  ;;  %v2714_v51 = vpop.f32.mrf.mxu1 }
 0x106   : > { %1950 = vst.msk [vmem:[%s3197_s18 + $0x48] sm:$0xf] %vm1931_vm3, %v2450_v46  ;;  %2014 = vst.msk [vmem:[%s3197_s18 + $0x148] sm:$0xf] %vm1931_vm3, %v2514_v47  ;;  %v2448_v52 = vpack.c.bf16 %v973_v48, %v973_v48  ;;  %v984_v54 = vadd.f32 %v2650_v50, %v3189_v6  ;;  %v1240_v55 = vadd.f32 %v2714_v51, %v3189_v6 }
 0x107   : > { %v2512_v53 = vpack.c.bf16 %v1229_v49, %v1229_v49  ;;  %v975_v56 = vpop.f32.mrf.mxu0  ;;  %v1231_v57 = vpop.f32.mrf.mxu1 }
 0x108   : > { %1948 = vst.msk [vmem:[%s3197_s18 + $0x40] sm:$0xf] %vm1931_vm3, %v2448_v52  ;;  %v2451_v58 = vpack.c.bf16 %v984_v54, %v984_v54  ;;  %v2515_v59 = vpack.c.bf16 %v1240_v55, %v1240_v55  ;;  %v976_v60 = vadd.f32 %v3189_v6, %v975_v56  ;;  %v1232_v61 = vadd.f32 %v3189_v6, %v1231_v57 }
 0x109   : > { %2012 = vst.msk [vmem:[%s3197_s18 + $0x140] sm:$0xf] %vm1931_vm3, %v2512_v53  ;;  %v2653_v62 = vpop.f32.mrf.mxu0  ;;  %v2717_v63 = vpop.f32.mrf.mxu1 }
 0x10a   : > { %1951 = vst.msk [vmem:[%s3197_s18 + $0x4c] sm:$0xf] %vm1931_vm3, %v2451_v58  ;;  %2015 = vst.msk [vmem:[%s3197_s18 + $0x14c] sm:$0xf] %vm1931_vm3, %v2515_v59  ;;  %v2449_v0 = vpack.c.bf16 %v976_v60, %v976_v60  ;;  %v2513_v1 = vpack.c.bf16 %v1232_v61, %v1232_v61  ;;  %v997_v2 = vadd.f32 %v2653_v62, %v3189_v6 }
 0x10b   : > { %v1253_v3 = vadd.f32 %v2717_v63, %v3189_v6  ;;  %v988_v4 = vpop.f32.mrf.mxu0  ;;  %v1244_v5 = vpop.f32.mrf.mxu1 }
 0x10c   : > { %1949 = vst.msk [vmem:[%s3197_s18 + $0x44] sm:$0xf] %vm1931_vm3, %v2449_v0  ;;  %2013 = vst.msk [vmem:[%s3197_s18 + $0x144] sm:$0xf] %vm1931_vm3, %v2513_v1  ;;  %v2454_v7 = vpack.c.bf16 %v997_v2, %v997_v2  ;;  %v989_v9 = vadd.f32 %v3189_v6, %v988_v4  ;;  %v1245_v10 = vadd.f32 %v3189_v6, %v1244_v5 }
 0x10d   : > { %v2518_v8 = vpack.c.bf16 %v1253_v3, %v1253_v3  ;;  %v2654_v11 = vpop.f32.mrf.mxu0  ;;  %v2718_v12 = vpop.f32.mrf.mxu1 }
 0x10e   : > { %1954 = vst.msk [vmem:[%s3197_s18 + $0x58] sm:$0xf] %vm1931_vm3, %v2454_v7  ;;  %v2452_v13 = vpack.c.bf16 %v989_v9, %v989_v9  ;;  %v2516_v14 = vpack.c.bf16 %v1245_v10, %v1245_v10  ;;  %v1000_v15 = vadd.f32 %v2654_v11, %v3189_v6  ;;  %v1256_v16 = vadd.f32 %v2718_v12, %v3189_v6 }
 0x10f   : > { %2018 = vst.msk [vmem:[%s3197_s18 + $0x158] sm:$0xf] %vm1931_vm3, %v2518_v8  ;;  %v991_v17 = vpop.f32.mrf.mxu0  ;;  %v1247_v18 = vpop.f32.mrf.mxu1 }
 0x110   : > { %1952 = vst.msk [vmem:[%s3197_s18 + $0x50] sm:$0xf] %vm1931_vm3, %v2452_v13  ;;  %2016 = vst.msk [vmem:[%s3197_s18 + $0x150] sm:$0xf] %vm1931_vm3, %v2516_v14  ;;  %v2455_v19 = vpack.c.bf16 %v1000_v15, %v1000_v15  ;;  %v2519_v20 = vpack.c.bf16 %v1256_v16, %v1256_v16  ;;  %v992_v21 = vadd.f32 %v3189_v6, %v991_v17 }
 0x111   : > { %v1248_v22 = vadd.f32 %v3189_v6, %v1247_v18  ;;  %v2657_v23 = vpop.f32.mrf.mxu0  ;;  %v2721_v24 = vpop.f32.mrf.mxu1 }
 0x112   : > { %1955 = vst.msk [vmem:[%s3197_s18 + $0x5c] sm:$0xf] %vm1931_vm3, %v2455_v19  ;;  %2019 = vst.msk [vmem:[%s3197_s18 + $0x15c] sm:$0xf] %vm1931_vm3, %v2519_v20  ;;  %v2453_v25 = vpack.c.bf16 %v992_v21, %v992_v21  ;;  %v1013_v27 = vadd.f32 %v2657_v23, %v3189_v6  ;;  %v1269_v28 = vadd.f32 %v2721_v24, %v3189_v6 }
 0x113   : > { %v2517_v26 = vpack.c.bf16 %v1248_v22, %v1248_v22  ;;  %v1004_v29 = vpop.f32.mrf.mxu0  ;;  %v1260_v30 = vpop.f32.mrf.mxu1 }
 0x114   : > { %1953 = vst.msk [vmem:[%s3197_s18 + $0x54] sm:$0xf] %vm1931_vm3, %v2453_v25  ;;  %v2458_v31 = vpack.c.bf16 %v1013_v27, %v1013_v27  ;;  %v2522_v32 = vpack.c.bf16 %v1269_v28, %v1269_v28  ;;  %v1005_v33 = vadd.f32 %v3189_v6, %v1004_v29  ;;  %v1261_v34 = vadd.f32 %v3189_v6, %v1260_v30 }
 0x115   : > { %2017 = vst.msk [vmem:[%s3197_s18 + $0x154] sm:$0xf] %vm1931_vm3, %v2517_v26  ;;  %v2658_v35 = vpop.f32.mrf.mxu0  ;;  %v2722_v36 = vpop.f32.mrf.mxu1 }
 0x116   : > { %1958 = vst.msk [vmem:[%s3197_s18 + $0x68] sm:$0xf] %vm1931_vm3, %v2458_v31  ;;  %2022 = vst.msk [vmem:[%s3197_s18 + $0x168] sm:$0xf] %vm1931_vm3, %v2522_v32  ;;  %v2456_v37 = vpack.c.bf16 %v1005_v33, %v1005_v33  ;;  %v2520_v38 = vpack.c.bf16 %v1261_v34, %v1261_v34  ;;  %v1016_v39 = vadd.f32 %v2658_v35, %v3189_v6 }
 0x117   : > { %v1272_v40 = vadd.f32 %v2722_v36, %v3189_v6  ;;  %v1007_v41 = vpop.f32.mrf.mxu0  ;;  %v1263_v42 = vpop.f32.mrf.mxu1 }
 0x118   : > { %1956 = vst.msk [vmem:[%s3197_s18 + $0x60] sm:$0xf] %vm1931_vm3, %v2456_v37  ;;  %2020 = vst.msk [vmem:[%s3197_s18 + $0x160] sm:$0xf] %vm1931_vm3, %v2520_v38  ;;  %v2459_v43 = vpack.c.bf16 %v1016_v39, %v1016_v39  ;;  %v1008_v45 = vadd.f32 %v3189_v6, %v1007_v41  ;;  %v1264_v46 = vadd.f32 %v3189_v6, %v1263_v42 }
 0x119   : > { %v2523_v44 = vpack.c.bf16 %v1272_v40, %v1272_v40  ;;  %v2661_v47 = vpop.f32.mrf.mxu0  ;;  %v2725_v48 = vpop.f32.mrf.mxu1 }
 0x11a   : > { %1959 = vst.msk [vmem:[%s3197_s18 + $0x6c] sm:$0xf] %vm1931_vm3, %v2459_v43  ;;  %v2457_v49 = vpack.c.bf16 %v1008_v45, %v1008_v45  ;;  %v2521_v50 = vpack.c.bf16 %v1264_v46, %v1264_v46  ;;  %v1029_v51 = vadd.f32 %v2661_v47, %v3189_v6  ;;  %v1285_v52 = vadd.f32 %v2725_v48, %v3189_v6 }
 0x11b   : > { %2023 = vst.msk [vmem:[%s3197_s18 + $0x16c] sm:$0xf] %vm1931_vm3, %v2523_v44  ;;  %v1020_v53 = vpop.f32.mrf.mxu0  ;;  %v1276_v54 = vpop.f32.mrf.mxu1 }
 0x11c   : > { %1957 = vst.msk [vmem:[%s3197_s18 + $0x64] sm:$0xf] %vm1931_vm3, %v2457_v49  ;;  %2021 = vst.msk [vmem:[%s3197_s18 + $0x164] sm:$0xf] %vm1931_vm3, %v2521_v50  ;;  %v2462_v55 = vpack.c.bf16 %v1029_v51, %v1029_v51  ;;  %v2526_v56 = vpack.c.bf16 %v1285_v52, %v1285_v52  ;;  %v1021_v57 = vadd.f32 %v3189_v6, %v1020_v53 }
 0x11d   : > { %v1277_v58 = vadd.f32 %v3189_v6, %v1276_v54  ;;  %v2662_v59 = vpop.f32.mrf.mxu0  ;;  %v2726_v60 = vpop.f32.mrf.mxu1 }
 0x11e   : > { %1962 = vst.msk [vmem:[%s3197_s18 + $0x78] sm:$0xf] %vm1931_vm3, %v2462_v55  ;;  %2026 = vst.msk [vmem:[%s3197_s18 + $0x178] sm:$0xf] %vm1931_vm3, %v2526_v56  ;;  %v2460_v61 = vpack.c.bf16 %v1021_v57, %v1021_v57  ;;  %v1032_v63 = vadd.f32 %v2662_v59, %v3189_v6  ;;  %v1288_v0 = vadd.f32 %v2726_v60, %v3189_v6 }
 0x11f   : > { %v2524_v62 = vpack.c.bf16 %v1277_v58, %v1277_v58  ;;  %v1023_v1 = vpop.f32.mrf.mxu0  ;;  %v1279_v2 = vpop.f32.mrf.mxu1 }
 0x120   : > { %1960 = vst.msk [vmem:[%s3197_s18 + $0x70] sm:$0xf] %vm1931_vm3, %v2460_v61  ;;  %v2463_v3 = vpack.c.bf16 %v1032_v63, %v1032_v63  ;;  %v2527_v4 = vpack.c.bf16 %v1288_v0, %v1288_v0  ;;  %v1024_v5 = vadd.f32 %v3189_v6, %v1023_v1  ;;  %v1280_v7 = vadd.f32 %v3189_v6, %v1279_v2 }
 0x121   : > { %2024 = vst.msk [vmem:[%s3197_s18 + $0x170] sm:$0xf] %vm1931_vm3, %v2524_v62  ;;  %v2665_v8 = vpop.f32.mrf.mxu0  ;;  %v2729_v9 = vpop.f32.mrf.mxu1 }
 0x122   : > { %1963 = vst.msk [vmem:[%s3197_s18 + $0x7c] sm:$0xf] %vm1931_vm3, %v2463_v3  ;;  %2027 = vst.msk [vmem:[%s3197_s18 + $0x17c] sm:$0xf] %vm1931_vm3, %v2527_v4  ;;  %v2461_v10 = vpack.c.bf16 %v1024_v5, %v1024_v5  ;;  %v2525_v11 = vpack.c.bf16 %v1280_v7, %v1280_v7  ;;  %v1045_v12 = vadd.f32 %v2665_v8, %v3189_v6 }
 0x123   : > { %v1301_v13 = vadd.f32 %v2729_v9, %v3189_v6  ;;  %v1036_v14 = vpop.f32.mrf.mxu0  ;;  %v1292_v15 = vpop.f32.mrf.mxu1 }
 0x124   : > { %1961 = vst.msk [vmem:[%s3197_s18 + $0x74] sm:$0xf] %vm1931_vm3, %v2461_v10  ;;  %2025 = vst.msk [vmem:[%s3197_s18 + $0x174] sm:$0xf] %vm1931_vm3, %v2525_v11  ;;  %v2466_v16 = vpack.c.bf16 %v1045_v12, %v1045_v12  ;;  %v1037_v18 = vadd.f32 %v3189_v6, %v1036_v14  ;;  %v1293_v19 = vadd.f32 %v3189_v6, %v1292_v15 }
 0x125   : > { %v2530_v17 = vpack.c.bf16 %v1301_v13, %v1301_v13  ;;  %v2666_v20 = vpop.f32.mrf.mxu0  ;;  %v2730_v21 = vpop.f32.mrf.mxu1 }
 0x126   : > { %1966 = vst.msk [vmem:[%s3197_s18 + $0x88] sm:$0xf] %vm1931_vm3, %v2466_v16  ;;  %v2464_v22 = vpack.c.bf16 %v1037_v18, %v1037_v18  ;;  %v2528_v23 = vpack.c.bf16 %v1293_v19, %v1293_v19  ;;  %v1048_v24 = vadd.f32 %v2666_v20, %v3189_v6  ;;  %v1304_v25 = vadd.f32 %v2730_v21, %v3189_v6 }
 0x127   : > { %2030 = vst.msk [vmem:[%s3197_s18 + $0x188] sm:$0xf] %vm1931_vm3, %v2530_v17  ;;  %v1039_v26 = vpop.f32.mrf.mxu0  ;;  %v1295_v27 = vpop.f32.mrf.mxu1 }
 0x128   : > { %1964 = vst.msk [vmem:[%s3197_s18 + $0x80] sm:$0xf] %vm1931_vm3, %v2464_v22  ;;  %2028 = vst.msk [vmem:[%s3197_s18 + $0x180] sm:$0xf] %vm1931_vm3, %v2528_v23  ;;  %v2467_v28 = vpack.c.bf16 %v1048_v24, %v1048_v24  ;;  %v2531_v29 = vpack.c.bf16 %v1304_v25, %v1304_v25  ;;  %v1040_v30 = vadd.f32 %v3189_v6, %v1039_v26 }
 0x129   : > { %v1296_v31 = vadd.f32 %v3189_v6, %v1295_v27  ;;  %v2669_v32 = vpop.f32.mrf.mxu0  ;;  %v2733_v33 = vpop.f32.mrf.mxu1 }
 0x12a   : > { %1967 = vst.msk [vmem:[%s3197_s18 + $0x8c] sm:$0xf] %vm1931_vm3, %v2467_v28  ;;  %2031 = vst.msk [vmem:[%s3197_s18 + $0x18c] sm:$0xf] %vm1931_vm3, %v2531_v29  ;;  %v2465_v34 = vpack.c.bf16 %v1040_v30, %v1040_v30  ;;  %v1061_v36 = vadd.f32 %v2669_v32, %v3189_v6  ;;  %v1317_v37 = vadd.f32 %v2733_v33, %v3189_v6 }
 0x12b   : > { %v2529_v35 = vpack.c.bf16 %v1296_v31, %v1296_v31  ;;  %v1052_v38 = vpop.f32.mrf.mxu0  ;;  %v1308_v39 = vpop.f32.mrf.mxu1 }
 0x12c   : > { %1965 = vst.msk [vmem:[%s3197_s18 + $0x84] sm:$0xf] %vm1931_vm3, %v2465_v34  ;;  %v2470_v40 = vpack.c.bf16 %v1061_v36, %v1061_v36  ;;  %v2534_v41 = vpack.c.bf16 %v1317_v37, %v1317_v37  ;;  %v1053_v42 = vadd.f32 %v3189_v6, %v1052_v38  ;;  %v1309_v43 = vadd.f32 %v3189_v6, %v1308_v39 }
 0x12d   : > { %2029 = vst.msk [vmem:[%s3197_s18 + $0x184] sm:$0xf] %vm1931_vm3, %v2529_v35  ;;  %v2670_v44 = vpop.f32.mrf.mxu0  ;;  %v2734_v45 = vpop.f32.mrf.mxu1 }
 0x12e   : > { %1970 = vst.msk [vmem:[%s3197_s18 + $0x98] sm:$0xf] %vm1931_vm3, %v2470_v40  ;;  %2034 = vst.msk [vmem:[%s3197_s18 + $0x198] sm:$0xf] %vm1931_vm3, %v2534_v41  ;;  %v2468_v46 = vpack.c.bf16 %v1053_v42, %v1053_v42  ;;  %v2532_v47 = vpack.c.bf16 %v1309_v43, %v1309_v43  ;;  %v1064_v48 = vadd.f32 %v2670_v44, %v3189_v6 }
 0x12f   : > { %v1320_v49 = vadd.f32 %v2734_v45, %v3189_v6  ;;  %v1055_v50 = vpop.f32.mrf.mxu0  ;;  %v1311_v51 = vpop.f32.mrf.mxu1 }
 0x130   : > { %1968 = vst.msk [vmem:[%s3197_s18 + $0x90] sm:$0xf] %vm1931_vm3, %v2468_v46  ;;  %2032 = vst.msk [vmem:[%s3197_s18 + $0x190] sm:$0xf] %vm1931_vm3, %v2532_v47  ;;  %v2471_v52 = vpack.c.bf16 %v1064_v48, %v1064_v48  ;;  %v1056_v54 = vadd.f32 %v3189_v6, %v1055_v50  ;;  %v1312_v55 = vadd.f32 %v3189_v6, %v1311_v51 }
 0x131   : > { %v2535_v53 = vpack.c.bf16 %v1320_v49, %v1320_v49  ;;  %v2673_v56 = vpop.f32.mrf.mxu0  ;;  %v2737_v57 = vpop.f32.mrf.mxu1 }
 0x132   : > { %1971 = vst.msk [vmem:[%s3197_s18 + $0x9c] sm:$0xf] %vm1931_vm3, %v2471_v52  ;;  %v2469_v58 = vpack.c.bf16 %v1056_v54, %v1056_v54  ;;  %v2533_v59 = vpack.c.bf16 %v1312_v55, %v1312_v55  ;;  %v1077_v60 = vadd.f32 %v2673_v56, %v3189_v6  ;;  %v1333_v61 = vadd.f32 %v2737_v57, %v3189_v6 }
 0x133   : > { %2035 = vst.msk [vmem:[%s3197_s18 + $0x19c] sm:$0xf] %vm1931_vm3, %v2535_v53  ;;  %v1068_v62 = vpop.f32.mrf.mxu0  ;;  %v1324_v63 = vpop.f32.mrf.mxu1 }
 0x134   : > { %1969 = vst.msk [vmem:[%s3197_s18 + $0x94] sm:$0xf] %vm1931_vm3, %v2469_v58  ;;  %2033 = vst.msk [vmem:[%s3197_s18 + $0x194] sm:$0xf] %vm1931_vm3, %v2533_v59  ;;  %v2474_v0 = vpack.c.bf16 %v1077_v60, %v1077_v60  ;;  %v2538_v1 = vpack.c.bf16 %v1333_v61, %v1333_v61  ;;  %v1069_v2 = vadd.f32 %v3189_v6, %v1068_v62 }
 0x135   : > { %v1325_v3 = vadd.f32 %v3189_v6, %v1324_v63  ;;  %v2674_v4 = vpop.f32.mrf.mxu0  ;;  %v2738_v5 = vpop.f32.mrf.mxu1 }
 0x136   : > { %1974 = vst.msk [vmem:[%s3197_s18 + $0xa8] sm:$0xf] %vm1931_vm3, %v2474_v0  ;;  %2038 = vst.msk [vmem:[%s3197_s18 + $0x1a8] sm:$0xf] %vm1931_vm3, %v2538_v1  ;;  %v2472_v7 = vpack.c.bf16 %v1069_v2, %v1069_v2  ;;  %v1080_v9 = vadd.f32 %v2674_v4, %v3189_v6  ;;  %v1336_v10 = vadd.f32 %v2738_v5, %v3189_v6 }
 0x137   : > { %v2536_v8 = vpack.c.bf16 %v1325_v3, %v1325_v3  ;;  %v1071_v11 = vpop.f32.mrf.mxu0  ;;  %v1327_v12 = vpop.f32.mrf.mxu1 }
 0x138   : > { %1972 = vst.msk [vmem:[%s3197_s18 + $0xa0] sm:$0xf] %vm1931_vm3, %v2472_v7  ;;  %v2475_v13 = vpack.c.bf16 %v1080_v9, %v1080_v9  ;;  %v2539_v14 = vpack.c.bf16 %v1336_v10, %v1336_v10  ;;  %v1072_v15 = vadd.f32 %v3189_v6, %v1071_v11  ;;  %v1328_v16 = vadd.f32 %v3189_v6, %v1327_v12 }
 0x139   : > { %2036 = vst.msk [vmem:[%s3197_s18 + $0x1a0] sm:$0xf] %vm1931_vm3, %v2536_v8  ;;  %v2677_v17 = vpop.f32.mrf.mxu0  ;;  %v2741_v18 = vpop.f32.mrf.mxu1 }
 0x13a   : > { %1975 = vst.msk [vmem:[%s3197_s18 + $0xac] sm:$0xf] %vm1931_vm3, %v2475_v13  ;;  %2039 = vst.msk [vmem:[%s3197_s18 + $0x1ac] sm:$0xf] %vm1931_vm3, %v2539_v14  ;;  %v2473_v19 = vpack.c.bf16 %v1072_v15, %v1072_v15  ;;  %v2537_v20 = vpack.c.bf16 %v1328_v16, %v1328_v16  ;;  %v1093_v21 = vadd.f32 %v2677_v17, %v3189_v6 }
 0x13b   : > { %v1349_v22 = vadd.f32 %v2741_v18, %v3189_v6  ;;  %v1084_v23 = vpop.f32.mrf.mxu0  ;;  %v1340_v24 = vpop.f32.mrf.mxu1 }
 0x13c   : > { %1973 = vst.msk [vmem:[%s3197_s18 + $0xa4] sm:$0xf] %vm1931_vm3, %v2473_v19  ;;  %2037 = vst.msk [vmem:[%s3197_s18 + $0x1a4] sm:$0xf] %vm1931_vm3, %v2537_v20  ;;  %v2478_v25 = vpack.c.bf16 %v1093_v21, %v1093_v21  ;;  %v1085_v27 = vadd.f32 %v3189_v6, %v1084_v23  ;;  %v1341_v28 = vadd.f32 %v3189_v6, %v1340_v24 }
 0x13d   : > { %v2542_v26 = vpack.c.bf16 %v1349_v22, %v1349_v22  ;;  %v2678_v29 = vpop.f32.mrf.mxu0  ;;  %v2742_v30 = vpop.f32.mrf.mxu1 }
 0x13e   : > { %1978 = vst.msk [vmem:[%s3197_s18 + $0xb8] sm:$0xf] %vm1931_vm3, %v2478_v25  ;;  %v2476_v31 = vpack.c.bf16 %v1085_v27, %v1085_v27  ;;  %v2540_v32 = vpack.c.bf16 %v1341_v28, %v1341_v28  ;;  %v1096_v33 = vadd.f32 %v2678_v29, %v3189_v6  ;;  %v1352_v34 = vadd.f32 %v2742_v30, %v3189_v6 }
 0x13f   : > { %2042 = vst.msk [vmem:[%s3197_s18 + $0x1b8] sm:$0xf] %vm1931_vm3, %v2542_v26  ;;  %v1087_v35 = vpop.f32.mrf.mxu0  ;;  %v1343_v36 = vpop.f32.mrf.mxu1 }
 0x140   : > { %1976 = vst.msk [vmem:[%s3197_s18 + $0xb0] sm:$0xf] %vm1931_vm3, %v2476_v31  ;;  %2040 = vst.msk [vmem:[%s3197_s18 + $0x1b0] sm:$0xf] %vm1931_vm3, %v2540_v32  ;;  %v2479_v37 = vpack.c.bf16 %v1096_v33, %v1096_v33  ;;  %v2543_v38 = vpack.c.bf16 %v1352_v34, %v1352_v34  ;;  %v1088_v39 = vadd.f32 %v3189_v6, %v1087_v35 }
 0x141   : > { %v1344_v40 = vadd.f32 %v3189_v6, %v1343_v36  ;;  %v2681_v41 = vpop.f32.mrf.mxu0  ;;  %v2745_v42 = vpop.f32.mrf.mxu1 }
 0x142   : > { %1979 = vst.msk [vmem:[%s3197_s18 + $0xbc] sm:$0xf] %vm1931_vm3, %v2479_v37  ;;  %2043 = vst.msk [vmem:[%s3197_s18 + $0x1bc] sm:$0xf] %vm1931_vm3, %v2543_v38  ;;  %v2477_v43 = vpack.c.bf16 %v1088_v39, %v1088_v39  ;;  %v1109_v45 = vadd.f32 %v2681_v41, %v3189_v6  ;;  %v1365_v46 = vadd.f32 %v2745_v42, %v3189_v6 }
 0x143   : > { %v2541_v44 = vpack.c.bf16 %v1344_v40, %v1344_v40  ;;  %v1100_v47 = vpop.f32.mrf.mxu0  ;;  %v1356_v48 = vpop.f32.mrf.mxu1 }
 0x144   : > { %1977 = vst.msk [vmem:[%s3197_s18 + $0xb4] sm:$0xf] %vm1931_vm3, %v2477_v43  ;;  %v2482_v49 = vpack.c.bf16 %v1109_v45, %v1109_v45  ;;  %v2546_v50 = vpack.c.bf16 %v1365_v46, %v1365_v46  ;;  %v1101_v51 = vadd.f32 %v3189_v6, %v1100_v47  ;;  %v1357_v52 = vadd.f32 %v3189_v6, %v1356_v48 }
 0x145   : > { %2041 = vst.msk [vmem:[%s3197_s18 + $0x1b4] sm:$0xf] %vm1931_vm3, %v2541_v44  ;;  %v2682_v53 = vpop.f32.mrf.mxu0  ;;  %v2746_v54 = vpop.f32.mrf.mxu1 }
 0x146   : > { %1982 = vst.msk [vmem:[%s3197_s18 + $0xc8] sm:$0xf] %vm1931_vm3, %v2482_v49  ;;  %2046 = vst.msk [vmem:[%s3197_s18 + $0x1c8] sm:$0xf] %vm1931_vm3, %v2546_v50  ;;  %v2480_v55 = vpack.c.bf16 %v1101_v51, %v1101_v51  ;;  %v2544_v56 = vpack.c.bf16 %v1357_v52, %v1357_v52  ;;  %v1112_v57 = vadd.f32 %v2682_v53, %v3189_v6 }
 0x147   : > { %v1368_v58 = vadd.f32 %v2746_v54, %v3189_v6  ;;  %v1103_v59 = vpop.f32.mrf.mxu0  ;;  %v1359_v60 = vpop.f32.mrf.mxu1 }
 0x148   : > { %1980 = vst.msk [vmem:[%s3197_s18 + $0xc0] sm:$0xf] %vm1931_vm3, %v2480_v55  ;;  %2044 = vst.msk [vmem:[%s3197_s18 + $0x1c0] sm:$0xf] %vm1931_vm3, %v2544_v56  ;;  %v2483_v61 = vpack.c.bf16 %v1112_v57, %v1112_v57  ;;  %v1104_v63 = vadd.f32 %v3189_v6, %v1103_v59  ;;  %v1360_v0 = vadd.f32 %v3189_v6, %v1359_v60 }
 0x149   : > { %v2547_v62 = vpack.c.bf16 %v1368_v58, %v1368_v58  ;;  %v2685_v1 = vpop.f32.mrf.mxu0  ;;  %v2749_v2 = vpop.f32.mrf.mxu1 }
 0x14a   : > { %1983 = vst.msk [vmem:[%s3197_s18 + $0xcc] sm:$0xf] %vm1931_vm3, %v2483_v61  ;;  %v2481_v3 = vpack.c.bf16 %v1104_v63, %v1104_v63  ;;  %v2545_v4 = vpack.c.bf16 %v1360_v0, %v1360_v0  ;;  %v1125_v5 = vadd.f32 %v2685_v1, %v3189_v6  ;;  %v1381_v7 = vadd.f32 %v2749_v2, %v3189_v6 }
 0x14b   : > { %2047 = vst.msk [vmem:[%s3197_s18 + $0x1cc] sm:$0xf] %vm1931_vm3, %v2547_v62  ;;  %v1116_v8 = vpop.f32.mrf.mxu0  ;;  %v1372_v9 = vpop.f32.mrf.mxu1 }
 0x14c   : > { %1981 = vst.msk [vmem:[%s3197_s18 + $0xc4] sm:$0xf] %vm1931_vm3, %v2481_v3  ;;  %2045 = vst.msk [vmem:[%s3197_s18 + $0x1c4] sm:$0xf] %vm1931_vm3, %v2545_v4  ;;  %v2486_v10 = vpack.c.bf16 %v1125_v5, %v1125_v5  ;;  %v2550_v11 = vpack.c.bf16 %v1381_v7, %v1381_v7  ;;  %v1117_v12 = vadd.f32 %v3189_v6, %v1116_v8 }
 0x14d   : > { %v1373_v13 = vadd.f32 %v3189_v6, %v1372_v9  ;;  %v2686_v14 = vpop.f32.mrf.mxu0  ;;  %v2750_v15 = vpop.f32.mrf.mxu1 }
 0x14e   : > { %1986 = vst.msk [vmem:[%s3197_s18 + $0xd8] sm:$0xf] %vm1931_vm3, %v2486_v10  ;;  %2050 = vst.msk [vmem:[%s3197_s18 + $0x1d8] sm:$0xf] %vm1931_vm3, %v2550_v11  ;;  %v2484_v16 = vpack.c.bf16 %v1117_v12, %v1117_v12  ;;  %v1128_v18 = vadd.f32 %v2686_v14, %v3189_v6  ;;  %v1384_v19 = vadd.f32 %v2750_v15, %v3189_v6 }
 0x14f   : > { %v2548_v17 = vpack.c.bf16 %v1373_v13, %v1373_v13  ;;  %v1119_v20 = vpop.f32.mrf.mxu0  ;;  %v1375_v21 = vpop.f32.mrf.mxu1 }
 0x150   : > { %1984 = vst.msk [vmem:[%s3197_s18 + $0xd0] sm:$0xf] %vm1931_vm3, %v2484_v16  ;;  %v2487_v22 = vpack.c.bf16 %v1128_v18, %v1128_v18  ;;  %v2551_v23 = vpack.c.bf16 %v1384_v19, %v1384_v19  ;;  %v1120_v24 = vadd.f32 %v3189_v6, %v1119_v20  ;;  %v1376_v25 = vadd.f32 %v3189_v6, %v1375_v21 }
 0x151   : > { %2048 = vst.msk [vmem:[%s3197_s18 + $0x1d0] sm:$0xf] %vm1931_vm3, %v2548_v17  ;;  %v2689_v26 = vpop.f32.mrf.mxu0  ;;  %v2753_v27 = vpop.f32.mrf.mxu1 }
 0x152   : > { %1987 = vst.msk [vmem:[%s3197_s18 + $0xdc] sm:$0xf] %vm1931_vm3, %v2487_v22  ;;  %2051 = vst.msk [vmem:[%s3197_s18 + $0x1dc] sm:$0xf] %vm1931_vm3, %v2551_v23  ;;  %v2485_v28 = vpack.c.bf16 %v1120_v24, %v1120_v24  ;;  %v2549_v29 = vpack.c.bf16 %v1376_v25, %v1376_v25  ;;  %v1141_v30 = vadd.f32 %v2689_v26, %v3189_v6 }
 0x153   : > { %v1397_v31 = vadd.f32 %v2753_v27, %v3189_v6  ;;  %v1132_v32 = vpop.f32.mrf.mxu0  ;;  %v1388_v33 = vpop.f32.mrf.mxu1 }
 0x154   : > { %1985 = vst.msk [vmem:[%s3197_s18 + $0xd4] sm:$0xf] %vm1931_vm3, %v2485_v28  ;;  %2049 = vst.msk [vmem:[%s3197_s18 + $0x1d4] sm:$0xf] %vm1931_vm3, %v2549_v29  ;;  %v2490_v34 = vpack.c.bf16 %v1141_v30, %v1141_v30  ;;  %v1133_v36 = vadd.f32 %v3189_v6, %v1132_v32  ;;  %v1389_v37 = vadd.f32 %v3189_v6, %v1388_v33 }
 0x155   : > { %v2554_v35 = vpack.c.bf16 %v1397_v31, %v1397_v31  ;;  %v2690_v38 = vpop.f32.mrf.mxu0  ;;  %v2754_v39 = vpop.f32.mrf.mxu1 }
 0x156   : > { %1990 = vst.msk [vmem:[%s3197_s18 + $0xe8] sm:$0xf] %vm1931_vm3, %v2490_v34  ;;  %v2488_v40 = vpack.c.bf16 %v1133_v36, %v1133_v36  ;;  %v2552_v41 = vpack.c.bf16 %v1389_v37, %v1389_v37  ;;  %v1144_v42 = vadd.f32 %v2690_v38, %v3189_v6  ;;  %v1400_v43 = vadd.f32 %v2754_v39, %v3189_v6 }
 0x157   : > { %2054 = vst.msk [vmem:[%s3197_s18 + $0x1e8] sm:$0xf] %vm1931_vm3, %v2554_v35  ;;  %v1135_v44 = vpop.f32.mrf.mxu0  ;;  %v1391_v45 = vpop.f32.mrf.mxu1 }
 0x158   : > { %1988 = vst.msk [vmem:[%s3197_s18 + $0xe0] sm:$0xf] %vm1931_vm3, %v2488_v40  ;;  %2052 = vst.msk [vmem:[%s3197_s18 + $0x1e0] sm:$0xf] %vm1931_vm3, %v2552_v41  ;;  %v2491_v46 = vpack.c.bf16 %v1144_v42, %v1144_v42  ;;  %v2555_v47 = vpack.c.bf16 %v1400_v43, %v1400_v43  ;;  %v1136_v48 = vadd.f32 %v3189_v6, %v1135_v44 }
 0x159   : > { %v1392_v49 = vadd.f32 %v3189_v6, %v1391_v45  ;;  %v2693_v50 = vpop.f32.mrf.mxu0  ;;  %v2757_v51 = vpop.f32.mrf.mxu1 }
 0x15a   : > { %1991 = vst.msk [vmem:[%s3197_s18 + $0xec] sm:$0xf] %vm1931_vm3, %v2491_v46  ;;  %2055 = vst.msk [vmem:[%s3197_s18 + $0x1ec] sm:$0xf] %vm1931_vm3, %v2555_v47  ;;  %v2489_v52 = vpack.c.bf16 %v1136_v48, %v1136_v48  ;;  %v1157_v54 = vadd.f32 %v2693_v50, %v3189_v6  ;;  %v1413_v55 = vadd.f32 %v2757_v51, %v3189_v6 }
 0x15b   : > { %v2553_v53 = vpack.c.bf16 %v1392_v49, %v1392_v49  ;;  %v1148_v56 = vpop.f32.mrf.mxu0  ;;  %v1404_v57 = vpop.f32.mrf.mxu1 }
 0x15c   : > { %1989 = vst.msk [vmem:[%s3197_s18 + $0xe4] sm:$0xf] %vm1931_vm3, %v2489_v52  ;;  %v2494_v58 = vpack.c.bf16 %v1157_v54, %v1157_v54  ;;  %v2558_v59 = vpack.c.bf16 %v1413_v55, %v1413_v55  ;;  %v1149_v60 = vadd.f32 %v3189_v6, %v1148_v56  ;;  %v1405_v61 = vadd.f32 %v3189_v6, %v1404_v57 }
 0x15d   : > { %2053 = vst.msk [vmem:[%s3197_s18 + $0x1e4] sm:$0xf] %vm1931_vm3, %v2553_v53  ;;  %v2694_v62 = vpop.f32.mrf.mxu0  ;;  %v2758_v63 = vpop.f32.mrf.mxu1 }
 0x15e   : > { %1994 = vst.msk [vmem:[%s3197_s18 + $0xf8] sm:$0xf] %vm1931_vm3, %v2494_v58  ;;  %2058 = vst.msk [vmem:[%s3197_s18 + $0x1f8] sm:$0xf] %vm1931_vm3, %v2558_v59  ;;  %v2492_v0 = vpack.c.bf16 %v1149_v60, %v1149_v60  ;;  %v2556_v1 = vpack.c.bf16 %v1405_v61, %v1405_v61  ;;  %v1160_v2 = vadd.f32 %v2694_v62, %v3189_v6 }
 0x15f   : > { %v1416_v3 = vadd.f32 %v2758_v63, %v3189_v6  ;;  %v1151_v4 = vpop.f32.mrf.mxu0  ;;  %v1407_v5 = vpop.f32.mrf.mxu1 }
 0x160   : > { %1992 = vst.msk [vmem:[%s3197_s18 + $0xf0] sm:$0xf] %vm1931_vm3, %v2492_v0  ;;  %2056 = vst.msk [vmem:[%s3197_s18 + $0x1f0] sm:$0xf] %vm1931_vm3, %v2556_v1  ;;  %v2495_v7 = vpack.c.bf16 %v1160_v2, %v1160_v2  ;;  %v1152_v9 = vadd.f32 %v3189_v6, %v1151_v4  ;;  %v1408_v10 = vadd.f32 %v3189_v6, %v1407_v5 }
 0x161   : > { %v2559_v8 = vpack.c.bf16 %v1416_v3, %v1416_v3 }
 0x162   : > { %1995 = vst.msk [vmem:[%s3197_s18 + $0xfc] sm:$0xf] %vm1931_vm3, %v2495_v7  ;;  %v2493_v11 = vpack.c.bf16 %v1152_v9, %v1152_v9  ;;  %v2557_v12 = vpack.c.bf16 %v1408_v10, %v1408_v10 }
 0x163   : > { %2059 = vst.msk [vmem:[%s3197_s18 + $0x1fc] sm:$0xf] %vm1931_vm3, %v2559_v8 }
 0x164   : > { %1993 = vst.msk [vmem:[%s3197_s18 + $0xf4] sm:$0xf] %vm1931_vm3, %v2493_v11  ;;  %2057 = vst.msk [vmem:[%s3197_s18 + $0x1f4] sm:$0xf] %vm1931_vm3, %v2557_v12 }
 0x165   : > { %2900 = shalt.err (!%p2897_p5)
}
 0x166   : > { %s2901_s5 = scalar_lea.hbm %s3576_s15, 8192  ;;  %s2905_s8 = scalar_lea.hbm %s3638_s3, 16384 }
 0x167   : > { %p2902_p6 = scmp.ne.s32.totalorder %s3576_s15, %s2901_s5  ;;  %p2906_p10 = scmp.lt.s32.totalorder %s3576_s15, %s3638_s3 }
 0x168   : > { %p2907_p11 = scmp.lt.s32.totalorder %s2905_s8, %s2901_s5 }
 0x169   : > { %p2903_p7 = pnand %p2902_p6, %p3029_p4 }
 0x16a   : > { %p2908_p12 = por %p2907_p11, %p2906_p10 }
 0x16b   : > { %p2904_p9 = pneg %p2903_p7 }
 0x16d   : > { %p2909_p13 = pnand %p2908_p12, %p2904_p9 }
 0x16f   : > { %2912 = shalt.err (!%p2909_p13)
}
 0x170   : > { %s2967_s11 = smov 64   ;;  %s2968_s18 = smov 4  }
 0x171   : > { %2763 = dma.vmem_to_hbm [thread:$0]  (%p3029_p4), %s3578_s21, 8192, %s3576_s15, %s3590_s27, %s2967_s11, %s2967_s11, %s2968_s18  }
 0x172 PF: > { %p2769_p0 = scmp.ge.s32.totalorder %s2963_s17, 2  ;;  %s2092_s19 = sand.u32 1, %s2943_s12  }
 0x173   : > { %s2093_s23 = scalar_lea.sflag [#allocation3], %s2092_s19 }
 0x174   : > { %p2766_p1 = pnand %p2769_p0, %p3036_p8 }
 0x176   : > { %p2767_p2 = pneg %p2766_p1 }
 0x178   : > { %2938 = dma.done.wait (%p2767_p2), %s2093_s23, 8192  }
 0x179   : > { %2940 = vsyncadd (%p2767_p2), %s2093_s23, 4294959104  ;;  %s16_s17 = sadd.s32 1, %s2963_s17   ;;  %s3641_s12 = smov %s2947_s13 }
 0x17a   : > { %p13_p3 = scmp.ge.s32.totalorder %s16_s17, 4   ;;  %s3642_s13 = smov %s2951_s14 }
 0x17b   : > { %s3643_s14 = smov %s3042_s25  ;;  %s3644_s15 = smov %s2959_s16 }
 0x17c   : > { %s3645_s16 = smov %s3647_s20  ;;  %15 = sbr.rel (!%p13_p3) target bundleno = 4 (0x4), region = 67 }
 0x181   :  { %2098 = vsyncpa [#allocation3], 1 }
 0x182   :  { %2100 = vsyncpa [#allocation3 + $0x1], 1 }

</bundles_post_ra>
